<compile_context>
chip_gen: v7x
topology: tpu7x:2x2x1
jax: 0.10.0
libtpu: 0.0.40
codegen_flags: <defaults>
</compile_context>

<pallas_src>
import jax
import jax.numpy as jnp
import numpy as np
from jax import lax
from jax.experimental import pallas as pl
from jax.experimental.pallas import tpu as pltpu

# Module hyper-parameters (nn.Module __init__ defaults; no learned weights).
TRANSLATION_WEIGHT = 1.0
ROTATION_WEIGHT = 10.0
SCALE_WEIGHT = 20.0
HUBER_DELTA = 1.0
_EPS = 1e-8                     # F.normalize eps
_EPS2 = _EPS * _EPS
_CLAMP_MAX = 1.0 - 1e-7

_DEFAULT_TILE_T = 512           # poses per grid step (multiple of 128)


# ---------------------------------------------------------------------------
# Kernel
# ---------------------------------------------------------------------------
def _make_kernel(B, T_real, tile, num_tiles):
    inv_trans = 1.0 / float(B * T_real * 3)
    inv_bt = 1.0 / float(B * T_real)
    inv_T = 1.0 / float(T_real)
    needs_valid = (num_tiles * tile != T_real)   # zero-padded tail lanes exist

    def kernel(pred_ref, gt_ref, mask_ref, out_ref,
               acc_trans, acc_angle, acc_tn, acc_tn2):
        # pred_ref / gt_ref: [7, B, tile]  (channels leading, T on lanes)
        # mask_ref:          [B, tile]
        pid = pl.program_id(0)

        @pl.when(pid == 0)
        def _init():
            acc_trans[...] = jnp.zeros_like(acc_trans)
            acc_angle[...] = jnp.zeros_like(acc_angle)
            acc_tn[...] = jnp.zeros_like(acc_tn)
            acc_tn2[...] = jnp.zeros_like(acc_tn2)

        f32 = jnp.float32
        m = mask_ref[...].astype(f32)                            # [B, tile]

        # ---- translation (Huber) + scale-loss moments --------------------
        # (pred*m + gt*(1-m)) - gt == (pred - gt) * m
        # Huber: c = min(|d|, delta); h = c * (|d| - 0.5*c)   (select-free)
        hsum = None
        tnsq = None
        for c in range(3):
            p = pred_ref[c].astype(f32)                          # [B, tile]
            g = gt_ref[c].astype(f32)
            d = (p - g) * m
            ad = jnp.abs(d)
            cm = jnp.minimum(ad, HUBER_DELTA)
            h = cm * (ad - 0.5 * cm)
            hsum = h if hsum is None else hsum + h
            sq = p * p
            tnsq = sq if tnsq is None else tnsq + sq
        tn = jnp.sqrt(tnsq)                                      # [B, tile]

        # ---- rotation (quaternion geodesic) -------------------------------
        pp = gg = pg = None
        for c in range(3, 7):
            p = pred_ref[c].astype(f32)
            g = gt_ref[c].astype(f32)
            pp = p * p if pp is None else pp + p * p
            gg = g * g if gg is None else gg + g * g
            pg = p * g if pg is None else pg + p * g
        # |dot(p/max(|p|,eps), g/max(|g|,eps))| via one EUP rsqrt.
        inv_norm = lax.rsqrt(jnp.maximum(pp, _EPS2) * jnp.maximum(gg, _EPS2))
        absdot = jnp.minimum(jnp.abs(pg) * inv_norm, _CLAMP_MAX)
        angle = 2.0 * jnp.arctan2(jnp.sqrt(1.0 - absdot * absdot), absdot)

        if needs_valid:
            # Zero-padded tail lanes must not contribute to the rotation mean
            # (translation / scale terms are already exactly 0 there).
            col = pid * tile + lax.broadcasted_iota(jnp.int32, (B, tile), 1)
            angle = jnp.where(col < T_real, angle, 0.0)

        acc_trans[...] += jnp.sum(hsum, axis=-1, keepdims=True)   # [B, 1]
        acc_angle[...] += jnp.sum(angle, axis=-1, keepdims=True)
        acc_tn[...] += jnp.sum(tn, axis=-1, keepdims=True)
        acc_tn2[...] += jnp.sum(tnsq, axis=-1, keepdims=True)

        @pl.when(pid == num_tiles - 1)
        def _finalize():
            trans_loss = jnp.sum(acc_trans[...]) * inv_trans
            rot_loss = jnp.sum(acc_angle[...]) * inv_bt
            # one-pass scale loss: sum_t (tn - mean)^2 = sum tn^2 - (sum tn)^2/T
            per_b = acc_tn2[...] - acc_tn[...] * acc_tn[...] * inv_T
            scale_loss = jnp.sum(per_b) * inv_bt
            out_ref[0] = (TRANSLATION_WEIGHT * trans_loss
                          + ROTATION_WEIGHT * rot_loss
                          + SCALE_WEIGHT * scale_loss)
            out_ref[1] = trans_loss
            out_ref[2] = rot_loss
            out_ref[3] = scale_loss

    return kernel


# ---------------------------------------------------------------------------
# Wrapper
# ---------------------------------------------------------------------------
def robust_pose_loss(pred_poses, gt_poses, mask=None, *, tile_t=_DEFAULT_TILE_T):
    """JAX/Pallas equivalent of RobustPoseLoss.forward.

    pred_poses, gt_poses: [B, T, 7] (3 translation + 4 quaternion), f32 or bf16
    mask: optional [B, T]
    Returns dict of scalar losses (float32).
    """
    B, T, C = pred_poses.shape
    assert C == 7 and gt_poses.shape == (B, T, 7)

    # Lane-dense relayout: [B, T, 7] -> [7, B, T] (T on the lane axis).
    # Ideally the producer already emits this layout; doing it here is one
    # transpose of the packed tensor rather than four wrapper-side slices.
    pred_cbt = jnp.transpose(pred_poses, (2, 0, 1))
    gt_cbt = jnp.transpose(gt_poses, (2, 0, 1))
    if mask is None:
        mask_bt = jnp.ones((B, T), jnp.float32)
    else:
        mask_bt = mask.astype(jnp.float32).reshape(B, T)

    if T <= tile_t:
        tile, t_pad = T, T                      # single full-extent block
    else:
        tile = tile_t
        t_pad = ((T + tile - 1) // tile) * tile
        pad = t_pad - T
        if pad:
            pred_cbt = jnp.pad(pred_cbt, ((0, 0), (0, 0), (0, pad)))
            gt_cbt = jnp.pad(gt_cbt, ((0, 0), (0, 0), (0, pad)))
            mask_bt = jnp.pad(mask_bt, ((0, 0), (0, pad)))
    num_tiles = t_pad // tile

    kernel = _make_kernel(B, T, tile, num_tiles)
    out = pl.pallas_call(
        kernel,
        grid=(num_tiles,),
        in_specs=[
            pl.BlockSpec((7, B, tile), lambda i: (0, 0, i)),
            pl.BlockSpec((7, B, tile), lambda i: (0, 0, i)),
            pl.BlockSpec((B, tile), lambda i: (0, i)),
        ],
        out_specs=pl.BlockSpec(memory_space=pltpu.MemorySpace.SMEM),
        out_shape=jax.ShapeDtypeStruct((4,), jnp.float32),
        scratch_shapes=[
            pltpu.VMEM((B, 1), jnp.float32),   # huber sum
            pltpu.VMEM((B, 1), jnp.float32),   # angle sum
            pltpu.VMEM((B, 1), jnp.float32),   # sum ||t||
            pltpu.VMEM((B, 1), jnp.float32),   # sum ||t||^2
        ],
        compiler_params=pltpu.CompilerParams(
            # Accumulation axis must be "arbitrary". Blocks are small
            # (<= ~2*(7*B*tile*4) per step) so the default VMEM budget is
            # ample on v5e/v6e/v7x.
            # TODO(synk): for v7x megacore, emit per-block [num_tiles, >=8]
            # partial sums with a "parallel" axis + trailing XLA reduce.
            dimension_semantics=("arbitrary",),
        ),
    )(pred_cbt, gt_cbt, mask_bt)

    return {
        "total_loss": out[0],
        "translation_loss": out[1],
        "rotation_loss": out[2],
        "scale_loss": out[3],
    }


# ---------------------------------------------------------------------------
# Pure-JAX reference (mirrors the PyTorch module) for a correctness check.
# ---------------------------------------------------------------------------
def robust_pose_loss_ref(pred, gt, mask=None):
    pred = pred.astype(jnp.float32)
    gt = gt.astype(jnp.float32)
    pred_t, pred_r = pred[..., :3], pred[..., 3:]
    gt_t, gt_r = gt[..., :3], gt[..., 3:]
    if mask is not None:
        m = mask.astype(jnp.float32)[..., None]
        pt = pred_t * m + gt_t * (1.0 - m)
    else:
        pt = pred_t
    d = pt - gt_t
    ad = jnp.abs(d)
    huber = jnp.where(
        ad <= HUBER_DELTA, 0.5 * d * d, HUBER_DELTA * (ad - 0.5 * HUBER_DELTA)
    )
    trans = jnp.mean(huber)
    pn = pred_r / jnp.maximum(jnp.linalg.norm(pred_r, axis=-1, keepdims=True), _EPS)
    gn = gt_r / jnp.maximum(jnp.linalg.norm(gt_r, axis=-1, keepdims=True), _EPS)
    dot = jnp.sum(pn * gn, axis=-1)
    ad2 = jnp.minimum(jnp.abs(dot), _CLAMP_MAX)
    rot = jnp.mean(2.0 * jnp.arctan2(jnp.sqrt(1.0 - ad2 * ad2), ad2))
    tn = jnp.linalg.norm(pred_t, axis=-1)
    ms = jnp.mean(tn, axis=1, keepdims=True)
    scale = jnp.mean((tn - ms) ** 2)
    total = TRANSLATION_WEIGHT * trans + ROTATION_WEIGHT * rot + SCALE_WEIGHT * scale
    return total, trans, rot, scale


def _check(out, ref):
    names = ["total_loss", "translation_loss", "rotation_loss", "scale_loss"]
    for name, r in zip(names, ref):
        np.testing.assert_allclose(float(out[name]), float(r), rtol=1e-3, atol=1e-3)


if __name__ == "__main__":
    key = jax.random.PRNGKey(0)
    k1, k2, k3 = jax.random.split(key, 3)

    # --- small case: B=2, T=8 (single block, single grid step) -------------
    B, T = 2, 8
    pred = jax.random.normal(k1, (B, T, 7), dtype=jnp.float32)
    gt = jax.random.normal(k2, (B, T, 7), dtype=jnp.float32)
    mask = (jax.random.uniform(k3, (B, T)) > 0.3).astype(jnp.float32)

    out = robust_pose_loss(pred, gt, mask)
    jax.block_until_ready(out["total_loss"])
    _check(out, robust_pose_loss_ref(pred, gt, mask))

    # --- mask=None path -----------------------------------------------------
    out_nm = robust_pose_loss(pred, gt, None)
    jax.block_until_ready(out_nm["total_loss"])
    _check(out_nm, robust_pose_loss_ref(pred, gt, None))

    # --- multi-tile + ragged tail (accumulator + in-kernel lane masking) ----
    k4, k5, k6 = jax.random.split(jax.random.PRNGKey(1), 3)
    B2, T2 = 2, 300
    pred2 = jax.random.normal(k4, (B2, T2, 7), dtype=jnp.float32)
    gt2 = jax.random.normal(k5, (B2, T2, 7), dtype=jnp.float32)
    mask2 = (jax.random.uniform(k6, (B2, T2)) > 0.3).astype(jnp.float32)
    out2 = robust_pose_loss(pred2, gt2, mask2, tile_t=128)
    jax.block_until_ready(out2["total_loss"])
    _check(out2, robust_pose_loss_ref(pred2, gt2, mask2))

    print("KERNEL_OK")
</pallas_src>

<mosaic_0001>
module attributes {stable_mosaic.version = 11 : i64} {
  func.func @kernel(%arg0: i32, %arg1: memref<7x2x8xf32, #tpu.memory_space<vmem>>, %arg2: memref<7x2x8xf32, #tpu.memory_space<vmem>>, %arg3: memref<2x8xf32, #tpu.memory_space<vmem>>, %arg4: memref<4xf32, #tpu.memory_space<smem>>, %arg5: memref<2x1xf32, #tpu.memory_space<vmem>>, %arg6: memref<2x1xf32, #tpu.memory_space<vmem>>, %arg7: memref<2x1xf32, #tpu.memory_space<vmem>>, %arg8: memref<2x1xf32, #tpu.memory_space<vmem>>) attributes {dimension_semantics = [#tpu.dimension_semantics<arbitrary>], iteration_bounds = array<i64: 1>, scalar_prefetch = 0 : i64, scratch_operands = 4 : i64, tpu.core_type = #tpu.core_type<tc>, window_params = [{transform_indices = @transform_0, window_bounds = array<i64: 7, 2, 8>}, {transform_indices = @transform_1, window_bounds = array<i64: 7, 2, 8>}, {transform_indices = @transform_2, window_bounds = array<i64: 2, 8>}, {transform_indices = @transform_3, window_bounds = array<i64: 4>}]} {
    %c0_i32 = arith.constant 0 : i32
    %0 = arith.cmpi eq, %arg0, %c0_i32 : i32
    %1 = arith.extui %0 : i1 to i32
    %c0_i32_0 = arith.constant 0 : i32
    %2 = arith.cmpi ne, %1, %c0_i32_0 : i32
    scf.if %2 {
      %cst_70 = arith.constant 0.000000e+00 : f32
      %128 = vector.broadcast %cst_70 : f32 to vector<2x1xf32>
      %c0_71 = arith.constant 0 : index
      %c0_72 = arith.constant 0 : index
      %129 = vector.load %arg5[%c0_71, %c0_72] : memref<2x1xf32, #tpu.memory_space<vmem>>, vector<2x1xf32>
      tpu.vector_store %arg5[%c0_71, %c0_72], %128 {strides = array<i32>} : memref<2x1xf32, #tpu.memory_space<vmem>>, vector<2x1xf32>,
      %cst_73 = arith.constant 0.000000e+00 : f32
      %130 = vector.broadcast %cst_73 : f32 to vector<2x1xf32>
      %c0_74 = arith.constant 0 : index
      %c0_75 = arith.constant 0 : index
      %131 = vector.load %arg6[%c0_74, %c0_75] : memref<2x1xf32, #tpu.memory_space<vmem>>, vector<2x1xf32>
      tpu.vector_store %arg6[%c0_74, %c0_75], %130 {strides = array<i32>} : memref<2x1xf32, #tpu.memory_space<vmem>>, vector<2x1xf32>,
      %cst_76 = arith.constant 0.000000e+00 : f32
      %132 = vector.broadcast %cst_76 : f32 to vector<2x1xf32>
      %c0_77 = arith.constant 0 : index
      %c0_78 = arith.constant 0 : index
      %133 = vector.load %arg7[%c0_77, %c0_78] : memref<2x1xf32, #tpu.memory_space<vmem>>, vector<2x1xf32>
      tpu.vector_store %arg7[%c0_77, %c0_78], %132 {strides = array<i32>} : memref<2x1xf32, #tpu.memory_space<vmem>>, vector<2x1xf32>,
      %cst_79 = arith.constant 0.000000e+00 : f32
      %134 = vector.broadcast %cst_79 : f32 to vector<2x1xf32>
      %c0_80 = arith.constant 0 : index
      %c0_81 = arith.constant 0 : index
      %135 = vector.load %arg8[%c0_80, %c0_81] : memref<2x1xf32, #tpu.memory_space<vmem>>, vector<2x1xf32>
      tpu.vector_store %arg8[%c0_80, %c0_81], %134 {strides = array<i32>} : memref<2x1xf32, #tpu.memory_space<vmem>>, vector<2x1xf32>,
    } else {
    }
    %c0 = arith.constant 0 : index
    %c0_1 = arith.constant 0 : index
    %3 = vector.load %arg3[%c0, %c0_1] : memref<2x8xf32, #tpu.memory_space<vmem>>, vector<2x8xf32>
    %c0_2 = arith.constant 0 : index
    %c0_3 = arith.constant 0 : index
    %c0_4 = arith.constant 0 : index
    %4 = vector.load %arg1[%c0_2, %c0_3, %c0_4] : memref<7x2x8xf32, #tpu.memory_space<vmem>>, vector<1x2x8xf32>
    %5 = vector.shape_cast %4 : vector<1x2x8xf32> to vector<2x8xf32>
    %c0_5 = arith.constant 0 : index
    %c0_6 = arith.constant 0 : index
    %c0_7 = arith.constant 0 : index
    %6 = vector.load %arg2[%c0_5, %c0_6, %c0_7] : memref<7x2x8xf32, #tpu.memory_space<vmem>>, vector<1x2x8xf32>
    %7 = vector.shape_cast %6 : vector<1x2x8xf32> to vector<2x8xf32>
    %8 = arith.subf %5, %7 : vector<2x8xf32>
    %9 = arith.mulf %8, %3 : vector<2x8xf32>
    %10 = math.absf %9 : vector<2x8xf32>
    %cst = arith.constant 1.000000e+00 : f32
    %11 = vector.broadcast %cst : f32 to vector<2x8xf32>
    %12 = arith.minimumf %10, %11 : vector<2x8xf32>
    %cst_8 = arith.constant 5.000000e-01 : f32
    %13 = vector.broadcast %cst_8 : f32 to vector<2x8xf32>
    %14 = arith.mulf %13, %12 : vector<2x8xf32>
    %15 = arith.subf %10, %14 : vector<2x8xf32>
    %16 = arith.mulf %12, %15 : vector<2x8xf32>
    %17 = arith.mulf %5, %5 : vector<2x8xf32>
    %c1 = arith.constant 1 : index
    %c0_9 = arith.constant 0 : index
    %c0_10 = arith.constant 0 : index
    %18 = vector.load %arg1[%c1, %c0_9, %c0_10] : memref<7x2x8xf32, #tpu.memory_space<vmem>>, vector<1x2x8xf32>
    %19 = vector.shape_cast %18 : vector<1x2x8xf32> to vector<2x8xf32>
    %c1_11 = arith.constant 1 : index
    %c0_12 = arith.constant 0 : index
    %c0_13 = arith.constant 0 : index
    %20 = vector.load %arg2[%c1_11, %c0_12, %c0_13] : memref<7x2x8xf32, #tpu.memory_space<vmem>>, vector<1x2x8xf32>
    %21 = vector.shape_cast %20 : vector<1x2x8xf32> to vector<2x8xf32>
    %22 = arith.subf %19, %21 : vector<2x8xf32>
    %23 = arith.mulf %22, %3 : vector<2x8xf32>
    %24 = math.absf %23 : vector<2x8xf32>
    %cst_14 = arith.constant 1.000000e+00 : f32
    %25 = vector.broadcast %cst_14 : f32 to vector<2x8xf32>
    %26 = arith.minimumf %24, %25 : vector<2x8xf32>
    %cst_15 = arith.constant 5.000000e-01 : f32
    %27 = vector.broadcast %cst_15 : f32 to vector<2x8xf32>
    %28 = arith.mulf %27, %26 : vector<2x8xf32>
    %29 = arith.subf %24, %28 : vector<2x8xf32>
    %30 = arith.mulf %26, %29 : vector<2x8xf32>
    %31 = arith.addf %16, %30 : vector<2x8xf32>
    %32 = arith.mulf %19, %19 : vector<2x8xf32>
    %33 = arith.addf %17, %32 : vector<2x8xf32>
    %c2 = arith.constant 2 : index
    %c0_16 = arith.constant 0 : index
    %c0_17 = arith.constant 0 : index
    %34 = vector.load %arg1[%c2, %c0_16, %c0_17] : memref<7x2x8xf32, #tpu.memory_space<vmem>>, vector<1x2x8xf32>
    %35 = vector.shape_cast %34 : vector<1x2x8xf32> to vector<2x8xf32>
    %c2_18 = arith.constant 2 : index
    %c0_19 = arith.constant 0 : index
    %c0_20 = arith.constant 0 : index
    %36 = vector.load %arg2[%c2_18, %c0_19, %c0_20] : memref<7x2x8xf32, #tpu.memory_space<vmem>>, vector<1x2x8xf32>
    %37 = vector.shape_cast %36 : vector<1x2x8xf32> to vector<2x8xf32>
    %38 = arith.subf %35, %37 : vector<2x8xf32>
    %39 = arith.mulf %38, %3 : vector<2x8xf32>
    %40 = math.absf %39 : vector<2x8xf32>
    %cst_21 = arith.constant 1.000000e+00 : f32
    %41 = vector.broadcast %cst_21 : f32 to vector<2x8xf32>
    %42 = arith.minimumf %40, %41 : vector<2x8xf32>
    %cst_22 = arith.constant 5.000000e-01 : f32
    %43 = vector.broadcast %cst_22 : f32 to vector<2x8xf32>
    %44 = arith.mulf %43, %42 : vector<2x8xf32>
    %45 = arith.subf %40, %44 : vector<2x8xf32>
    %46 = arith.mulf %42, %45 : vector<2x8xf32>
    %47 = arith.addf %31, %46 : vector<2x8xf32>
    %48 = arith.mulf %35, %35 : vector<2x8xf32>
    %49 = arith.addf %33, %48 : vector<2x8xf32>
    %50 = math.sqrt %49 : vector<2x8xf32>
    %c3 = arith.constant 3 : index
    %c0_23 = arith.constant 0 : index
    %c0_24 = arith.constant 0 : index
    %51 = vector.load %arg1[%c3, %c0_23, %c0_24] : memref<7x2x8xf32, #tpu.memory_space<vmem>>, vector<1x2x8xf32>
    %52 = vector.shape_cast %51 : vector<1x2x8xf32> to vector<2x8xf32>
    %c3_25 = arith.constant 3 : index
    %c0_26 = arith.constant 0 : index
    %c0_27 = arith.constant 0 : index
    %53 = vector.load %arg2[%c3_25, %c0_26, %c0_27] : memref<7x2x8xf32, #tpu.memory_space<vmem>>, vector<1x2x8xf32>
    %54 = vector.shape_cast %53 : vector<1x2x8xf32> to vector<2x8xf32>
    %55 = arith.mulf %52, %52 : vector<2x8xf32>
    %56 = arith.mulf %54, %54 : vector<2x8xf32>
    %57 = arith.mulf %52, %54 : vector<2x8xf32>
    %c4 = arith.constant 4 : index
    %c0_28 = arith.constant 0 : index
    %c0_29 = arith.constant 0 : index
    %58 = vector.load %arg1[%c4, %c0_28, %c0_29] : memref<7x2x8xf32, #tpu.memory_space<vmem>>, vector<1x2x8xf32>
    %59 = vector.shape_cast %58 : vector<1x2x8xf32> to vector<2x8xf32>
    %c4_30 = arith.constant 4 : index
    %c0_31 = arith.constant 0 : index
    %c0_32 = arith.constant 0 : index
    %60 = vector.load %arg2[%c4_30, %c0_31, %c0_32] : memref<7x2x8xf32, #tpu.memory_space<vmem>>, vector<1x2x8xf32>
    %61 = vector.shape_cast %60 : vector<1x2x8xf32> to vector<2x8xf32>
    %62 = arith.mulf %59, %59 : vector<2x8xf32>
    %63 = arith.addf %55, %62 : vector<2x8xf32>
    %64 = arith.mulf %61, %61 : vector<2x8xf32>
    %65 = arith.addf %56, %64 : vector<2x8xf32>
    %66 = arith.mulf %59, %61 : vector<2x8xf32>
    %67 = arith.addf %57, %66 : vector<2x8xf32>
    %c5 = arith.constant 5 : index
    %c0_33 = arith.constant 0 : index
    %c0_34 = arith.constant 0 : index
    %68 = vector.load %arg1[%c5, %c0_33, %c0_34] : memref<7x2x8xf32, #tpu.memory_space<vmem>>, vector<1x2x8xf32>
    %69 = vector.shape_cast %68 : vector<1x2x8xf32> to vector<2x8xf32>
    %c5_35 = arith.constant 5 : index
    %c0_36 = arith.constant 0 : index
    %c0_37 = arith.constant 0 : index
    %70 = vector.load %arg2[%c5_35, %c0_36, %c0_37] : memref<7x2x8xf32, #tpu.memory_space<vmem>>, vector<1x2x8xf32>
    %71 = vector.shape_cast %70 : vector<1x2x8xf32> to vector<2x8xf32>
    %72 = arith.mulf %69, %69 : vector<2x8xf32>
    %73 = arith.addf %63, %72 : vector<2x8xf32>
    %74 = arith.mulf %71, %71 : vector<2x8xf32>
    %75 = arith.addf %65, %74 : vector<2x8xf32>
    %76 = arith.mulf %69, %71 : vector<2x8xf32>
    %77 = arith.addf %67, %76 : vector<2x8xf32>
    %c6 = arith.constant 6 : index
    %c0_38 = arith.constant 0 : index
    %c0_39 = arith.constant 0 : index
    %78 = vector.load %arg1[%c6, %c0_38, %c0_39] : memref<7x2x8xf32, #tpu.memory_space<vmem>>, vector<1x2x8xf32>
    %79 = vector.shape_cast %78 : vector<1x2x8xf32> to vector<2x8xf32>
    %c6_40 = arith.constant 6 : index
    %c0_41 = arith.constant 0 : index
    %c0_42 = arith.constant 0 : index
    %80 = vector.load %arg2[%c6_40, %c0_41, %c0_42] : memref<7x2x8xf32, #tpu.memory_space<vmem>>, vector<1x2x8xf32>
    %81 = vector.shape_cast %80 : vector<1x2x8xf32> to vector<2x8xf32>
    %82 = arith.mulf %79, %79 : vector<2x8xf32>
    %83 = arith.addf %73, %82 : vector<2x8xf32>
    %84 = arith.mulf %81, %81 : vector<2x8xf32>
    %85 = arith.addf %75, %84 : vector<2x8xf32>
    %86 = arith.mulf %79, %81 : vector<2x8xf32>
    %87 = arith.addf %77, %86 : vector<2x8xf32>
    %cst_43 = arith.constant 1.000000e-16 : f32
    %88 = vector.broadcast %cst_43 : f32 to vector<2x8xf32>
    %89 = arith.maximumf %83, %88 : vector<2x8xf32>
    %cst_44 = arith.constant 1.000000e-16 : f32
    %90 = vector.broadcast %cst_44 : f32 to vector<2x8xf32>
    %91 = arith.maximumf %85, %90 : vector<2x8xf32>
    %92 = arith.mulf %89, %91 : vector<2x8xf32>
    %93 = math.rsqrt %92 : vector<2x8xf32>
    %94 = math.absf %87 : vector<2x8xf32>
    %95 = arith.mulf %94, %93 : vector<2x8xf32>
    %cst_45 = arith.constant 0.99999988 : f32
    %96 = vector.broadcast %cst_45 : f32 to vector<2x8xf32>
    %97 = arith.minimumf %95, %96 : vector<2x8xf32>
    %98 = arith.mulf %97, %97 : vector<2x8xf32>
    %cst_46 = arith.constant 1.000000e+00 : f32
    %99 = vector.broadcast %cst_46 : f32 to vector<2x8xf32>
    %100 = arith.subf %99, %98 : vector<2x8xf32>
    %101 = math.sqrt %100 : vector<2x8xf32>
    %102 = math.atan2 %101, %97 : vector<2x8xf32>
    %cst_47 = arith.constant 2.000000e+00 : f32
    %103 = vector.broadcast %cst_47 : f32 to vector<2x8xf32>
    %104 = arith.mulf %103, %102 : vector<2x8xf32>
    %c0_48 = arith.constant 0 : index
    %c0_49 = arith.constant 0 : index
    %105 = vector.load %arg5[%c0_48, %c0_49] : memref<2x1xf32, #tpu.memory_space<vmem>>, vector<2x1xf32>
    %cst_50 = arith.constant dense<0.000000e+00> : vector<2xf32>
    %106 = vector.multi_reduction <add>, %47, %cst_50 [1] : vector<2x8xf32> to vector<2xf32>
    %107 = vector.shape_cast %106 : vector<2xf32> to vector<2x1xf32>
    %108 = arith.addf %105, %107 : vector<2x1xf32>
    %c0_51 = arith.constant 0 : index
    %c0_52 = arith.constant 0 : index
    %109 = vector.load %arg5[%c0_51, %c0_52] : memref<2x1xf32, #tpu.memory_space<vmem>>, vector<2x1xf32>
    tpu.vector_store %arg5[%c0_51, %c0_52], %108 {strides = array<i32>} : memref<2x1xf32, #tpu.memory_space<vmem>>, vector<2x1xf32>,
    %c0_53 = arith.constant 0 : index
    %c0_54 = arith.constant 0 : index
    %110 = vector.load %arg6[%c0_53, %c0_54] : memref<2x1xf32, #tpu.memory_space<vmem>>, vector<2x1xf32>
    %cst_55 = arith.constant dense<0.000000e+00> : vector<2xf32>
    %111 = vector.multi_reduction <add>, %104, %cst_55 [1] : vector<2x8xf32> to vector<2xf32>
    %112 = vector.shape_cast %111 : vector<2xf32> to vector<2x1xf32>
    %113 = arith.addf %110, %112 : vector<2x1xf32>
    %c0_56 = arith.constant 0 : index
    %c0_57 = arith.constant 0 : index
    %114 = vector.load %arg6[%c0_56, %c0_57] : memref<2x1xf32, #tpu.memory_space<vmem>>, vector<2x1xf32>
    tpu.vector_store %arg6[%c0_56, %c0_57], %113 {strides = array<i32>} : memref<2x1xf32, #tpu.memory_space<vmem>>, vector<2x1xf32>,
    %c0_58 = arith.constant 0 : index
    %c0_59 = arith.constant 0 : index
    %115 = vector.load %arg7[%c0_58, %c0_59] : memref<2x1xf32, #tpu.memory_space<vmem>>, vector<2x1xf32>
    %cst_60 = arith.constant dense<0.000000e+00> : vector<2xf32>
    %116 = vector.multi_reduction <add>, %50, %cst_60 [1] : vector<2x8xf32> to vector<2xf32>
    %117 = vector.shape_cast %116 : vector<2xf32> to vector<2x1xf32>
    %118 = arith.addf %115, %117 : vector<2x1xf32>
    %c0_61 = arith.constant 0 : index
    %c0_62 = arith.constant 0 : index
    %119 = vector.load %arg7[%c0_61, %c0_62] : memref<2x1xf32, #tpu.memory_space<vmem>>, vector<2x1xf32>
    tpu.vector_store %arg7[%c0_61, %c0_62], %118 {strides = array<i32>} : memref<2x1xf32, #tpu.memory_space<vmem>>, vector<2x1xf32>,
    %c0_63 = arith.constant 0 : index
    %c0_64 = arith.constant 0 : index
    %120 = vector.load %arg8[%c0_63, %c0_64] : memref<2x1xf32, #tpu.memory_space<vmem>>, vector<2x1xf32>
    %cst_65 = arith.constant dense<0.000000e+00> : vector<2xf32>
    %121 = vector.multi_reduction <add>, %49, %cst_65 [1] : vector<2x8xf32> to vector<2xf32>
    %122 = vector.shape_cast %121 : vector<2xf32> to vector<2x1xf32>
    %123 = arith.addf %120, %122 : vector<2x1xf32>
    %c0_66 = arith.constant 0 : index
    %c0_67 = arith.constant 0 : index
    %124 = vector.load %arg8[%c0_66, %c0_67] : memref<2x1xf32, #tpu.memory_space<vmem>>, vector<2x1xf32>
    tpu.vector_store %arg8[%c0_66, %c0_67], %123 {strides = array<i32>} : memref<2x1xf32, #tpu.memory_space<vmem>>, vector<2x1xf32>,
    %c0_i32_68 = arith.constant 0 : i32
    %125 = arith.cmpi eq, %arg0, %c0_i32_68 : i32
    %126 = arith.extui %125 : i1 to i32
    %c0_i32_69 = arith.constant 0 : i32
    %127 = arith.cmpi ne, %126, %c0_i32_69 : i32
    scf.if %127 {
      %c0_70 = arith.constant 0 : index
      %c0_71 = arith.constant 0 : index
      %128 = vector.load %arg5[%c0_70, %c0_71] : memref<2x1xf32, #tpu.memory_space<vmem>>, vector<2x1xf32>
      %129 = vector.shape_cast %128 : vector<2x1xf32> to vector<1x2x1xf32>
      %cst_72 = arith.constant dense<0.000000e+00> : vector<1xf32>
      %130 = vector.multi_reduction <add>, %129, %cst_72 [1, 2] : vector<1x2x1xf32> to vector<1xf32>
      %131 = vector.shape_cast %130 : vector<1xf32> to vector<1x1x1xf32>
      %132 = vector.extract %131[0, 0, 0] : f32 from vector<1x1x1xf32>
      %cst_73 = arith.constant 0.020833334 : f32
      %133 = arith.mulf %132, %cst_73 : f32
      %c0_74 = arith.constant 0 : index
      %c0_75 = arith.constant 0 : index
      %134 = vector.load %arg6[%c0_74, %c0_75] : memref<2x1xf32, #tpu.memory_space<vmem>>, vector<2x1xf32>
      %135 = vector.shape_cast %134 : vector<2x1xf32> to vector<1x2x1xf32>
      %cst_76 = arith.constant dense<0.000000e+00> : vector<1xf32>
      %136 = vector.multi_reduction <add>, %135, %cst_76 [1, 2] : vector<1x2x1xf32> to vector<1xf32>
      %137 = vector.shape_cast %136 : vector<1xf32> to vector<1x1x1xf32>
      %138 = vector.extract %137[0, 0, 0] : f32 from vector<1x1x1xf32>
      %cst_77 = arith.constant 6.250000e-02 : f32
      %139 = arith.mulf %138, %cst_77 : f32
      %c0_78 = arith.constant 0 : index
      %c0_79 = arith.constant 0 : index
      %140 = vector.load %arg8[%c0_78, %c0_79] : memref<2x1xf32, #tpu.memory_space<vmem>>, vector<2x1xf32>
      %c0_80 = arith.constant 0 : index
      %c0_81 = arith.constant 0 : index
      %141 = vector.load %arg7[%c0_80, %c0_81] : memref<2x1xf32, #tpu.memory_space<vmem>>, vector<2x1xf32>
      %c0_82 = arith.constant 0 : index
      %c0_83 = arith.constant 0 : index
      %142 = vector.load %arg7[%c0_82, %c0_83] : memref<2x1xf32, #tpu.memory_space<vmem>>, vector<2x1xf32>
      %143 = arith.mulf %141, %142 : vector<2x1xf32>
      %cst_84 = arith.constant 1.250000e-01 : f32
      %144 = vector.broadcast %cst_84 : f32 to vector<2x1xf32>
      %145 = arith.mulf %143, %144 : vector<2x1xf32>
      %146 = arith.subf %140, %145 : vector<2x1xf32>
      %147 = vector.shape_cast %146 : vector<2x1xf32> to vector<1x2x1xf32>
      %cst_85 = arith.constant dense<0.000000e+00> : vector<1xf32>
      %148 = vector.multi_reduction <add>, %147, %cst_85 [1, 2] : vector<1x2x1xf32> to vector<1xf32>
      %149 = vector.shape_cast %148 : vector<1xf32> to vector<1x1x1xf32>
      %150 = vector.extract %149[0, 0, 0] : f32 from vector<1x1x1xf32>
      %cst_86 = arith.constant 6.250000e-02 : f32
      %151 = arith.mulf %150, %cst_86 : f32
      %cst_87 = arith.constant 1.000000e+00 : f32
      %152 = arith.mulf %cst_87, %133 : f32
      %cst_88 = arith.constant 1.000000e+01 : f32
      %153 = arith.mulf %cst_88, %139 : f32
      %154 = arith.addf %152, %153 : f32
      %cst_89 = arith.constant 2.000000e+01 : f32
      %155 = arith.mulf %cst_89, %151 : f32
      %156 = arith.addf %154, %155 : f32
      %c0_90 = arith.constant 0 : index
      %157 = memref.load %arg4[%c0_90] : memref<4xf32, #tpu.memory_space<smem>>
      memref.store %156, %arg4[%c0_90] : memref<4xf32, #tpu.memory_space<smem>>
      %c1_91 = arith.constant 1 : index
      %158 = memref.load %arg4[%c1_91] : memref<4xf32, #tpu.memory_space<smem>>
      memref.store %133, %arg4[%c1_91] : memref<4xf32, #tpu.memory_space<smem>>
      %c2_92 = arith.constant 2 : index
      %159 = memref.load %arg4[%c2_92] : memref<4xf32, #tpu.memory_space<smem>>
      memref.store %139, %arg4[%c2_92] : memref<4xf32, #tpu.memory_space<smem>>
      %c3_93 = arith.constant 3 : index
      %160 = memref.load %arg4[%c3_93] : memref<4xf32, #tpu.memory_space<smem>>
      memref.store %151, %arg4[%c3_93] : memref<4xf32, #tpu.memory_space<smem>>
    } else {
    }
    return
  }
  func.func @transform_0(%arg0: i32) -> (i32, i32, i32) {
    %c0_i32 = arith.constant 0 : i32
    %c0_i32_0 = arith.constant 0 : i32
    %c0_i32_1 = arith.constant 0 : i32
    return %c0_i32, %c0_i32_0, %arg0 : i32, i32, i32
  }
  func.func @transform_1(%arg0: i32) -> (i32, i32, i32) {
    %c0_i32 = arith.constant 0 : i32
    %c0_i32_0 = arith.constant 0 : i32
    %c0_i32_1 = arith.constant 0 : i32
    return %c0_i32, %c0_i32_0, %arg0 : i32, i32, i32
  }
  func.func @transform_2(%arg0: i32) -> (i32, i32) {
    %c0_i32 = arith.constant 0 : i32
    %c0_i32_0 = arith.constant 0 : i32
    return %c0_i32, %arg0 : i32, i32
  }
  func.func @transform_3(%arg0: i32) -> i32 {
    %c0_i32 = arith.constant 0 : i32
    %c0_i32_0 = arith.constant 0 : i32
    return %c0_i32 : i32
  }
}

</mosaic_0001>

<bundles_post_ra>
// kernel: tpu_custom_call.1
= control target key start
LH: loop header
LB: loop body
LE: loop exit
PB: predicated region body
PF: predicated region fallthrough
CT: control target
= control target key end

     0   :  { %8 = vsyncpa [#allocation7], 0  ;;  %s471_s0 = inlined_call_operand.hbm [shape: f32[7,2,8], index: 0, kind: input, shape index: {}]   ;;  %s472_s1 = inlined_call_operand.hbm [shape: f32[7,2,8], index: 1, kind: input, shape index: {}]   ;;  %s473_s2 = inlined_call_operand.vmem [shape: f32[2,8], index: 2, kind: input, shape index: {}]   ;;  %s474_s3 = inlined_call_operand.hbm [shape: f32[4], index: 3, kind: output, shape index: {}]  }
   0x1   :  { %9 = vsyncpa [#allocation10], 0 }
   0x2   :  { %10 = vsyncpa [#allocation8], 0  ;;  %s376_s12 = smov [#allocation6]   ;;  %s316_s16 = scalar_lea.hbm %s471_s0, 224 }
   0x3   :  { %s16_s13 = sshll.u32 %s376_s12, 4  ;;  %p317_p0 = scmp.ne.s32.totalorder %s471_s0, %s316_s16  ;;  %s17_s13 = int_to_ptr.vmem [resolvable:$true] %s16_s13 }
   0x4   :  { %p320_p1 = scmp.lt.u32.totalorder %s316_s16, %s471_s0 }
   0x6   :  { %p322_p2 = pnand %p320_p1, %p317_p0 }
   0x8   :  { %325 = shalt.err (!%p322_p2)
}
   0x9   :  { %s326_s21 = scalar_lea.vmem %s17_s13, 224  ;;  %p331_p4 = scmp.lt.s32.totalorder %s17_s13, %s17_s13 }
   0xa   :  { %p327_p3 = scmp.ne.s32.totalorder %s17_s13, %s326_s21  ;;  %p332_p5 = scmp.lt.s32.totalorder %s326_s21, %s326_s21 }
   0xc   :  { %p333_p6 = por %p332_p5, %p331_p4 }
   0xe   :  { %p334_p7 = pnand %p333_p6, %p327_p3 }
  0x10   :  { %337 = shalt.err (!%p334_p7)
}
  0x11   :  { %s377_s22 = smov 32   ;;  %s378_s23 = smov 2  }
  0x12   :  { %22 = dma.hbm_to_vmem [thread:$0]  %s471_s0, 224, %s17_s13, [#allocation7], %s377_s22, %s377_s22, %s378_s23  }
  0x13   :  { %s379_s26 = smov [#allocation9]   ;;  %s338_s30 = scalar_lea.hbm %s472_s1, 224 }
  0x14   :  { %s28_s27 = sshll.u32 %s379_s26, 4  ;;  %p339_p8 = scmp.ne.s32.totalorder %s472_s1, %s338_s30  ;;  %s29_s27 = int_to_ptr.vmem [resolvable:$true] %s28_s27 }
  0x15   :  { %p342_p9 = scmp.lt.u32.totalorder %s338_s30, %s472_s1 }
  0x17   :  { %p344_p10 = pnand %p342_p9, %p339_p8 }
  0x19   :  { %347 = shalt.err (!%p344_p10)
}
  0x1a   :  { %s348_s8 = scalar_lea.vmem %s29_s27, 224  ;;  %p353_p12 = scmp.lt.s32.totalorder %s29_s27, %s29_s27 }
  0x1b   :  { %p349_p11 = scmp.ne.s32.totalorder %s29_s27, %s348_s8  ;;  %p354_p13 = scmp.lt.s32.totalorder %s348_s8, %s348_s8 }
  0x1d   :  { %p355_p0 = por %p354_p13, %p353_p12 }
  0x1f   :  { %p356_p1 = pnand %p355_p0, %p349_p11 }
  0x21   :  { %359 = shalt.err (!%p356_p1)
}
  0x22   :  { %34 = dma.hbm_to_vmem [thread:$0]  %s472_s1, 224, %s29_s27, [#allocation10], %s377_s22, %s377_s22, %s378_s23  }
  0x23   :  { %370 = dma.done.wait [#allocation7], 224  }
  0x24   :  { %371 = vsyncadd [#allocation7], 4294967072 }
  0x25   :  { %372 = dma.done.wait [#allocation10], 224  }
  0x26   :  { %373 = vsyncadd [#allocation10], 4294967072  ;;  %vm47_vm0 = vcmask 1024   ;;  %v380_v0 = vmov 0.0   ;;  %v53_v1 = vld [vmem:[#allocation6] sm:$0x3] }
  0x27   :  { %50 = vst.msk [vmem:[#allocation4] sm:$0x3] %vm47_vm0, %v380_v0  ;;  %48 = vst.msk [vmem:[#allocation2] sm:$0x3] %vm47_vm0, %v380_v0  ;;  %v64_v2 = vld [vmem:[#allocation6 + $0x2] sm:$0x3]  ;;  %v62_v4 = vmul.f32 %v53_v1, %v53_v1 }
  0x28   :  { %49 = vst.msk [vmem:[#allocation3] sm:$0x3] %vm47_vm0, %v380_v0  ;;  %51 = vst.msk [vmem:[#allocation5] sm:$0x3] %vm47_vm0, %v380_v0  ;;  %v78_v3 = vld [vmem:[#allocation6 + $0x4] sm:$0x3]  ;;  %v75_v5 = vmul.f32 %v64_v2, %v64_v2 }
  0x29   :  { %v89_v6 = vmul.f32 %v78_v3, %v78_v3  ;;  %v52_v7 = vld [vmem:[%s473_s2] sm:$0x3]  ;;  %v54_v8 = vld [vmem:[#allocation9] sm:$0x3]  ;;  %v66_v9 = vld [vmem:[#allocation9 + $0x2] sm:$0x3] }
  0x2a   :  { %v55_v10 = vsub.f32 %v53_v1, %v54_v8  ;;  %v67_v11 = vsub.f32 %v64_v2, %v66_v9  ;;  %v80_v12 = vld [vmem:[#allocation9 + $0x4] sm:$0x3]  ;;  %v99_v13 = vld [vmem:[#allocation6 + $0x6] sm:$0x3]  ;;  %v101_v14 = vld [vmem:[#allocation9 + $0x6] sm:$0x3]  ;;  %v76_v15 = vadd.f32 %v75_v5, %v62_v4 }
  0x2b   :  { %v81_v16 = vsub.f32 %v78_v3, %v80_v12  ;;  %v102_v17 = vmul.f32 %v99_v13, %v99_v13  ;;  %v106_v18 = vld [vmem:[#allocation6 + $0x8] sm:$0x3]  ;;  %v108_v19 = vld [vmem:[#allocation9 + $0x8] sm:$0x3]  ;;  %v116_v20 = vld [vmem:[#allocation6 + $0xa] sm:$0x3]  ;;  %v103_v23 = vmul.f32 %v101_v14, %v101_v14  ;;  %v104_v39 = vmul.f32 %v101_v14, %v99_v13 }
  0x2c   :  { %v56_v21 = vmul.f32 %v55_v10, %v52_v7  ;;  %v68_v22 = vmul.f32 %v67_v11, %v52_v7  ;;  %v109_v24 = vmul.f32 %v106_v18, %v106_v18  ;;  %v438_v25 = vadd.f32 %v89_v6, %v76_v15  ;;  %v118_v31 = vld [vmem:[#allocation9 + $0xa] sm:$0x3]  ;;  %v126_v33 = vld [vmem:[#allocation6 + $0xc] sm:$0x3]  ;;  %v128_v38 = vld [vmem:[#allocation9 + $0xc] sm:$0x3] }
  0x2d   :  { %v82_v26 = vmul.f32 %v81_v16, %v52_v7  ;;  %v111_v27 = vmul.f32 %v108_v19, %v108_v19  ;;  %v119_v32 = vmul.f32 %v116_v20, %v116_v20  ;;  %v113_v40 = vmul.f32 %v108_v19, %v106_v18  ;;  %s360_s22 = scalar_lea.hbm %s474_s3, 16 }
  0x2e   :  { %v57_v28 = vand.u32 2147483647, %v56_v21  ;;  %v69_v29 = vand.u32 2147483647, %v68_v22  ;;  %v110_v30 = vadd.f32 %v109_v24, %v102_v17  ;;  %308 = vrsqrt.f32 %v438_v25  ;;  %p361_p2 = scmp.ne.s32.totalorder %s474_s3, %s360_s22  ;;  %p364_p3 = scmp.lt.u32.totalorder %s360_s22, %s474_s3 }
  0x2f   :  { %v83_v36 = vand.u32 2147483647, %v82_v26  ;;  %v112_v37 = vadd.f32 %v111_v27, %v103_v23  ;;  %v121_v42 = vmul.f32 %v118_v31, %v118_v31  ;;  %v129_v46 = vmul.f32 %v126_v33, %v126_v33 }
  0x30   :  { %v58_v34 = vmin.f32 %v57_v28, 1.0  ;;  %v70_v35 = vmin.f32 %v69_v29, 1.0  ;;  %v120_v41 = vadd.f32 %v119_v32, %v110_v30  ;;  %v131_v48 = vmul.f32 %v128_v38, %v128_v38  ;;  %p366_p4 = pnand %p364_p3, %p361_p2 }
  0x31   :  { %v84_v45 = vmin.f32 %v83_v36, 1.0  ;;  %v122_v47 = vadd.f32 %v121_v42, %v112_v37  ;;  %v114_v53 = vadd.f32 %v113_v40, %v104_v39  ;;  %v123_v54 = vmul.f32 %v118_v31, %v116_v20 }
  0x32   :  { %v59_v43 = vmul.f32 0.5, %v58_v34  ;;  %v71_v44 = vmul.f32 0.5, %v70_v35  ;;  %v130_v52 = vadd.f32 %v129_v46, %v120_v41  ;;  %vm93_vm1 = vcmp.eq.f32.partialorder %v438_v25, inf }
  0x33   :  { %v85_v51 = vmul.f32 0.5, %v84_v45  ;;  %v132_v55 = vadd.f32 %v131_v48, %v122_v47  ;;  %v96_v1 = vand.u32 2147483648, %v438_v25  ;;  %vm95_vm2 = vcmp.eq.f32.partialorder %v438_v25, 0.0 }
  0x34   :  { %v60_v49 = vsub.f32 %v57_v28, %v59_v43  ;;  %v72_v50 = vsub.f32 %v69_v29, %v71_v44  ;;  %v135_v59 = vmax.f32 %v130_v52, 1e-16  ;;  %v124_v4 = vadd.f32 %v123_v54, %v114_v53 }
  0x35   :  { %v86_v58 = vsub.f32 %v83_v36, %v85_v51  ;;  %v136_v60 = vmax.f32 %v132_v55, 1e-16  ;;  %v133_v5 = vmul.f32 %v128_v38, %v126_v33  ;;  %vm200_vm3 = vcmask 58368  }
  0x36   :  { %v61_v56 = vmul.f32 %v60_v49, %v58_v34  ;;  %v73_v57 = vmul.f32 %v72_v50, %v70_v35  ;;  %v381_v52 = vmov 0.7853982  }
  0x37   :  { %v87_v62 = vmul.f32 %v86_v58, %v84_v45  ;;  %v137_v2 = vmul.f32 %v136_v60, %v135_v59  ;;  %v134_v10 = vadd.f32 %v133_v5, %v124_v4 }
  0x38   :  { %v74_v61 = vadd.f32 %v73_v57, %v61_v56  ;;  %v309_v63 = vpop.eup %308 }
  0x39   :  { %v92_v3 = vmul.f32 %v309_v63, %v438_v25  ;;  %310 = vrsqrt.f32 %v137_v2  ;;  %v139_v12 = vand.u32 2147483647, %v134_v10  ;;  %v213_v63 = vld [vmem:[#allocation4] sm:$0x3] }
  0x3a   :  { %v88_v7 = vadd.f32 %v87_v62, %v74_v61  ;;  %v220_v62 = vsel %vm200_vm3, %v438_v25, 0.0 }
  0x3b   :  { %v94_v6 = vsel %vm93_vm1, %v438_v25, %v92_v3  ;;  %v199_v3 = vld [vmem:[#allocation2] sm:$0x3] }
  0x3c   :  { %v97_v8 = vsel %vm95_vm2, %v96_v1, %v94_v6  ;;  %v201_v11 = vsel %vm200_vm3, %v88_v7, 0.0 }
  0x3d   :  { %v214_v9 = vsel %vm200_vm3, %v97_v8, 0.0  ;;  %v207_v8 = vld [vmem:[#allocation3] sm:$0x3] }
  0x3e   :  { %215 = vadd.xlane.f32.xlu0 %v214_v9 }
  0x42   :  { %202 = vadd.xlane.f32.xlu0 %v201_v11  ;;  %v219_v11 = vld [vmem:[#allocation5] sm:$0x3] }
  0x43   :  { %v311_v13 = vpop.eup %310 }
  0x44   :  { %v140_v14 = vmul.f32 %v311_v13, %v139_v12 }
  0x46   :  { %v141_v15 = vmin.f32 %v140_v14, 0.9999999 }
  0x48   :  { %v142_v16 = vmul.f32 %v141_v15, %v141_v15  ;;  %vm181_vm4 = vcmp.lt.s32.totalorder %v141_v15, 0  ;;  %v151_v23 = vand.u32 2147483647, %v141_v15  ;;  %vm185_vm8 = vcmp.ne.f32.partialorder %v141_v15, %v141_v15 }
  0x49   :  { %v182_v17 = vsel %vm181_vm4, 3.1415927, %v380_v0  ;;  %vm178_vm10 = vcmp.lt.f32.partialorder %v141_v15, 0.0 }
  0x4a   :  { %v143_v18 = vsub.f32 1.0, %v142_v16  ;;  %vm191_vm11 = vcmp.eq.s32.totalorder %v151_v23, inf  ;;  %v190_v53 = vsel %vm178_vm10, 2.3561945, %v381_v52 }
  0x4c   :  { %312 = vrsqrt.f32 %v143_v18  ;;  %vm146_vm5 = vcmp.eq.f32.partialorder %v143_v18, inf  ;;  %v149_v20 = vand.u32 2147483648, %v143_v18  ;;  %vm148_vm6 = vcmp.eq.f32.partialorder %v143_v18, 0.0 }
  0x56   :  { %v313_v19 = vpop.eup %312 }
  0x57   :  { %v145_v21 = vmul.f32 %v313_v19, %v143_v18 }
  0x59   :  { %v147_v22 = vsel %vm146_vm5, %v143_v18, %v145_v21 }
  0x5a   :  { %v150_v24 = vsel %vm148_vm6, %v149_v20, %v147_v22 }
  0x5b   :  { %v152_v26 = vand.u32 2147483647, %v150_v24  ;;  %vm186_vm9 = vcmp.ne.f32.partialorder %v150_v24, %v150_v24  ;;  %vm183_vm13 = vcmp.eq.f32.partialorder %v150_v24, 0.0  ;;  %v196_v56 = vand.u32 2147483648, %v150_v24 }
  0x5c   :  { %vm187_vm14 = vmor %vm185_vm8, %vm186_vm9 }
  0x5d   :  { %v154_v27 = vmax.f32 %v151_v23, %v152_v26  ;;  %v153_v28 = vmin.f32 %v151_v23, %v152_v26  ;;  %vm175_vm7 = vcmp.gt.f32.partialorder %v152_v26, %v151_v23  ;;  %vm192_vm12 = vcmp.eq.s32.totalorder %v152_v26, inf }
  0x5e   :  { %vm193_vm15 = vmand %vm191_vm11, %vm192_vm12 }
  0x5f   :  { %314 = vrcp.f32 %v154_v27 }
  0x69   :  { %v315_v29 = vpop.eup %314 }
  0x6a   :  { %v156_v30 = vmul.f32 %v315_v29, %v153_v28 }
  0x6c   :  { %v157_v31 = vmul.f32 %v156_v30, %v156_v30 }
  0x6e   :  { %v158_v32 = vmul.f32 0.002785687, %v157_v31 }
  0x70   :  { %v159_v33 = vadd.f32 -0.015866, %v158_v32 }
  0x72   :  { %v160_v0 = vmul.f32 %v159_v33, %v157_v31 }
  0x74   :  { %v161_v34 = vadd.f32 0.04247222, %v160_v0 }
  0x76   :  { %v162_v35 = vmul.f32 %v161_v34, %v157_v31 }
  0x78   :  { %v163_v36 = vadd.f32 -0.074975304, %v162_v35 }
  0x7a   :  { %v164_v37 = vmul.f32 %v163_v36, %v157_v31 }
  0x7c   :  { %v165_v38 = vadd.f32 0.1064488, %v164_v37 }
  0x7e   :  { %v166_v39 = vmul.f32 %v165_v38, %v157_v31 }
  0x80   :  { %v167_v40 = vadd.f32 -0.14207031, %v166_v39 }
  0x82   :  { %v168_v41 = vmul.f32 %v167_v40, %v157_v31 }
  0x84   :  { %v169_v42 = vadd.f32 0.19993454, %v168_v41 }
  0x86   :  { %v170_v43 = vmul.f32 %v169_v42, %v157_v31 }
  0x88   :  { %v171_v44 = vadd.f32 -0.33333147, %v170_v43 }
  0x8a   :  { %v172_v45 = vmul.f32 %v171_v44, %v157_v31 }
  0x8c   :  { %v173_v46 = vmul.f32 %v172_v45, %v156_v30 }
  0x8e   :  { %v174_v47 = vadd.f32 %v173_v46, %v156_v30 }
  0x90   :  { %v176_v48 = vsub.f32 1.5707964, %v174_v47 }
  0x92   :  { %v177_v49 = vsel %vm175_vm7, %v176_v48, %v174_v47 }
  0x93   :  { %v179_v50 = vsub.f32 3.1415927, %v177_v49 }
  0x95   :  { %v180_v51 = vsel %vm178_vm10, %v179_v50, %v177_v49 }
  0x96   :  { %v184_v54 = vsel %vm183_vm13, %v182_v17, %v180_v51 }
  0x97   :  { %v188_v55 = vsel %vm187_vm14, nan, %v184_v54 }
  0x98   :  { %v194_v57 = vsel %vm193_vm15, %v190_v53, %v188_v55 }
  0x99   :  { %v195_v58 = vand.u32 2147483647, %v194_v57 }
  0x9b   :  { %v197_v59 = vor.u32 %v196_v56, %v195_v58 }
  0x9d   :  { %v198_v60 = vmul.f32 2.0, %v197_v59 }
  0x9f   :  { %v208_v61 = vsel %vm200_vm3, %v198_v60, 0.0 }
  0xa0   :  { %209 = vadd.xlane.f32.xlu1 %v208_v61 }
  0xa4   :  { %221 = vadd.xlane.f32.xlu1 %v220_v62 }
  0xcb   :  { %v216_v1 = vpop.xlane.xlu0 %215 }
  0xcc   :  { %v217_v2 = vadd.f32 %v216_v1, %v213_v63 }
  0xce   :  { %218 = vst.msk [vmem:[#allocation4] sm:$0x3] %vm47_vm0, %v217_v2 }
  0xcf   :  { %v203_v4 = vpop.xlane.xlu0 %202 }
  0xd0   :  { %v204_v5 = vadd.f32 %v203_v4, %v199_v3 }
  0xd2   :  { %206 = vst.msk [vmem:[#allocation2] sm:$0x3] %vm47_vm0, %v204_v5 }
  0xd5   :  { %v253_v13 = vld [vmem:[#allocation4] sm:$0x3] }
  0xd6   :  { %v254_v14 = vmul.f32 %v253_v13, %v253_v13 }
  0xd8   :  { %v255_v17 = vmul.f32 0.125, %v254_v14 }
  0xd9   :  { %v228_v6 = vld [vmem:[#allocation2] sm:$0x3] }
  0xda   :  { %v229_v7 = vsel %vm47_vm0, %v228_v6, 0.0 }
  0xdb   :  { %230 = vadd.xlane.f32.xlu0 %v229_v7 }
 0x12d   :  { %v210_v9 = vpop.xlane.xlu1 %209 }
 0x12e   :  { %v211_v10 = vadd.f32 %v210_v9, %v207_v8 }
 0x130   :  { %212 = vst.msk [vmem:[#allocation3] sm:$0x3] %vm47_vm0, %v211_v10 }
 0x131   :  { %v222_v25 = vpop.xlane.xlu1 %221 }
 0x132   :  { %v223_v12 = vadd.f32 %v222_v25, %v219_v11 }
 0x134   :  { %224 = vst.msk [vmem:[#allocation5] sm:$0x3] %vm47_vm0, %v223_v12 }
 0x137   :  { %v240_v15 = vld [vmem:[#allocation3] sm:$0x3] }
 0x138   :  { %v241_v16 = vsel %vm47_vm0, %v240_v15, 0.0 }
 0x139   :  { %242 = vadd.xlane.f32.xlu1 %v241_v16 }
 0x13b   :  { %v252_v18 = vld [vmem:[#allocation5] sm:$0x3] }
 0x13c   :  { %v256_v19 = vsub.f32 %v252_v18, %v255_v17 }
 0x13e   :  { %v257_v20 = vsel %vm47_vm0, %v256_v19, 0.0 }
 0x13f   :  { %258 = vadd.xlane.f32.xlu0 %v257_v20 }
 0x168   :  { %v231_v21 = vpop.xlane.xlu0 %230 }
 0x169   :  { %v232_v22 = vrot.slane %v231_v21, 4 }
 0x16b   :  { %v233_v23 = vadd.f32 %v232_v22, %v231_v21 }
 0x16d   :  { %v234_v24 = vrot.slane %v233_v23, 2 }
 0x16f   :  { %v235_v26 = vadd.f32 %v234_v24, %v233_v23 }
 0x171   :  { %v236_v27 = vrot.slane %v235_v26, 1 }
 0x173   :  { %v237_v28 = vadd.f32 %v236_v27, %v235_v26 }
 0x175   :  { %295 = vpush %v237_v28 }
 0x1a6   :  { %s296_s2 = spop %295 }
 0x1a7   :  { %s239_s11 = smul.f32 0.020833334, %s296_s2 }
 0x1a9   :  { %275 = sst [smem:[#allocation11 + $0x1]] %s239_s11 }
 0x1c6   :  { %v243_v29 = vpop.xlane.xlu1 %242 }
 0x1c7   :  { %v244_v30 = vrot.slane %v243_v29, 4 }
 0x1c9   :  { %v245_v31 = vadd.f32 %v244_v30, %v243_v29 }
 0x1cb   :  { %v246_v32 = vrot.slane %v245_v31, 2 }
 0x1cc   :  { %v259_v33 = vpop.xlane.xlu0 %258 }
 0x1cd   :  { %v247_v0 = vadd.f32 %v246_v32, %v245_v31  ;;  %v260_v34 = vrot.slane %v259_v33, 4 }
 0x1cf   :  { %v261_v35 = vadd.f32 %v260_v34, %v259_v33  ;;  %v248_v36 = vrot.slane %v247_v0, 1 }
 0x1d1   :  { %v262_v37 = vrot.slane %v261_v35, 2  ;;  %v249_v38 = vadd.f32 %v248_v36, %v247_v0 }
 0x1d3   :  { %v263_v39 = vadd.f32 %v262_v37, %v261_v35  ;;  %297 = vpush %v249_v38 }
 0x1d5   :  { %v264_v40 = vrot.slane %v263_v39, 1 }
 0x1d7   :  { %v265_v41 = vadd.f32 %v264_v40, %v263_v39 }
 0x1d9   :  { %299 = vpush %v265_v41 }
 0x204   :  { %s298_s12 = spop %297 }
 0x205   :  { %s251_s13 = smul.f32 0.0625, %s298_s12 }
 0x207   :  { %277 = sst [smem:[#allocation11 + $0x2]] %s251_s13  ;;  %s268_s14 = smul.f32 10.0, %s251_s13 }
 0x209   :  { %s269_s17 = sadd.f32 %s268_s14, %s239_s11 }
 0x20a   :  { %s300_s15 = spop %299 }
 0x20b   :  { %s267_s16 = smul.f32 0.0625, %s300_s15 }
 0x20d   :  { %s270_s18 = smul.f32 20.0, %s267_s16  ;;  %279 = sst [smem:[#allocation11 + $0x3]] %s267_s16 }
 0x20f   :  { %s271_s19 = sadd.f32 %s270_s18, %s269_s17 }
 0x211   :  { %273 = sst [smem:[#allocation11]] %s271_s19 }
 0x212   :  { %369 = shalt.err (!%p366_p4)
}
 0x213   :  { %s382_s27 = smov [#allocation11]  }
 0x214   :  { %287 = dma.smem_to_hbm %s382_s27, 16, %s474_s3, [#allocation8]  }
 0x215   :  { %374 = dma.done.wait [#allocation8], 16  }
 0x216   :  { %375 = vsyncadd [#allocation8], 4294967280 }
 0x217   :  { %291 = sfence }
 0x218   :  { %292 = vsyncpa [#allocation7], 1 }
 0x219   :  { %293 = vsyncpa [#allocation10], 1 }
 0x21a   :  { %294 = vsyncpa [#allocation8], 1 }

</bundles_post_ra>
